<compile_context>
chip_gen: v7x
topology: tpu7x:2x2x1
jax: 0.10.0
libtpu: 0.0.40
codegen_flags: <defaults>
</compile_context>

<pallas_src>
import functools
import itertools

import jax
import jax.numpy as jnp
from jax.experimental import pallas as pl
from jax.experimental.pallas import tpu as pltpu


def _round_up(v, m):
    return ((v + m - 1) // m) * m


def _tpu_vmem_capacity():
    try:
        return int(pltpu.get_tpu_info().vmem_capacity_bytes)
    except Exception:
        return 64 * 1024 * 1024


_VMEM_CAP = _tpu_vmem_capacity()
_BIG_VMEM = _VMEM_CAP >= 96 * 1024 * 1024           # v5e/v6e: 128 MiB; v7x: 64 MiB
_VMEM_LIMIT = min((_VMEM_CAP * 3) // 4, (96 if _BIG_VMEM else 40) * 1024 * 1024)
_TM_MAX = 512 if _BIG_VMEM else 256                 # bigger M tiles where VMEM allows


# ----------------------------- Pallas kernels ---------------------------------------------

def _make_gemm_kernel(relu, has_res):
    """out = act(x @ w + bias (+ res)); bf16 operands, f32 accumulation, bf16 store."""

    def kernel(x_ref, w_ref, b_ref, *rest):
        if has_res:
            r_ref, o_ref = rest
        else:
            (o_ref,) = rest
        acc = jnp.dot(x_ref[...], w_ref[...], preferred_element_type=jnp.float32)
        acc = acc + b_ref[...]                      # (1, TN) broadcasts over (TM, TN)
        if has_res:
            acc = acc + r_ref[...].astype(jnp.float32)
        if relu:
            acc = jnp.maximum(acc, 0.0)
        o_ref[...] = acc.astype(o_ref.dtype)

    return kernel


def _make_conv3x3_kernel(offsets, tm, relu, concat_taps):
    """Stride-1 3x3 conv on the flattened padded grid.

    x_hbm: (rows, Cin) flat padded activation in HBM (memory_space=ANY).
    Each step DMAs rows [i*tm, i*tm + tm + halo) into VMEM; tap t reads the static slice
    [offsets[t], offsets[t] + tm).  concat_taps -> one dot with K = 9*Cin, else 9 dots.
    """

    def kernel(x_hbm, w_ref, b_ref, o_ref, buf, sem):
        i = pl.program_id(0)
        start = pl.multiple_of(i * tm, tm)
        cp = pltpu.make_async_copy(x_hbm.at[pl.ds(start, buf.shape[0])], buf, sem)
        cp.start()
        cp.wait()
        if concat_taps:
            lhs = jnp.concatenate([buf[o:o + tm, :] for o in offsets], axis=1)
            acc = jnp.dot(lhs, w_ref[...], preferred_element_type=jnp.float32)
        else:
            acc = jnp.dot(buf[offsets[0]:offsets[0] + tm, :], w_ref[0],
                          preferred_element_type=jnp.float32)
            for t, o in enumerate(offsets[1:], start=1):
                acc = acc + jnp.dot(buf[o:o + tm, :], w_ref[t],
                                    preferred_element_type=jnp.float32)
        acc = acc + b_ref[...]
        if relu:
            acc = jnp.maximum(acc, 0.0)
        o_ref[...] = acc.astype(o_ref.dtype)

    return kernel


def _make_pool3x3_kernel(offsets, tm):
    """Stride-1 3x3 max on the flattened padded grid (subsampled to stride 2 outside)."""

    def kernel(x_hbm, o_ref, buf, sem):
        i = pl.program_id(0)
        start = pl.multiple_of(i * tm, tm)
        cp = pltpu.make_async_copy(x_hbm.at[pl.ds(start, buf.shape[0])], buf, sem)
        cp.start()
        cp.wait()
        m = buf[offsets[0]:offsets[0] + tm, :]
        for o in offsets[1:]:
            m = jnp.maximum(m, buf[o:o + tm, :])
        o_ref[...] = m

    return kernel


def _pool_mean_kernel(x_ref, o_ref):        # (B, HW, TC) -> (B, TC) f32
    o_ref[...] = jnp.mean(x_ref[...].astype(jnp.float32), axis=1)


# ----------------------------- GEMM wrapper -------------------------------------------------

def _pick_tn(n, n_m_tiles):
    # Keep weights VMEM-resident across all M tiles (TN = N).  Only split N when the grid
    # would otherwise be a single step (late layers / small batch) so v7x's two TCs both
    # get work; splitting then costs no extra weight streaming.
    if n_m_tiles == 1 and n >= 256:
        return n // 2
    return n


def _gemm(x, w, bias, res, relu, out_dtype=jnp.bfloat16):
    """out[M,N] = act(x @ w + bias (+ res)); x: [M,K], w: [K,N]."""
    M, K = x.shape
    N = w.shape[1]
    TM = min(_TM_MAX, _round_up(M, 16))
    Mp = _round_up(M, TM)
    n_m = Mp // TM
    TN = _pick_tn(N, n_m)

    def pad_m(a):
        return a if a.shape[0] == Mp else jnp.pad(a, ((0, Mp - a.shape[0]), (0, 0)))

    inputs = [pad_m(x).astype(jnp.bfloat16), w.astype(jnp.bfloat16),
              bias.astype(jnp.float32).reshape(1, N)]
    in_specs = [pl.BlockSpec((TM, K), lambda i, j: (i, 0)),
                pl.BlockSpec((K, TN), lambda i, j: (0, j)),
                pl.BlockSpec((1, TN), lambda i, j: (0, j))]
    if res is not None:
        inputs.append(pad_m(res).astype(jnp.bfloat16))
        in_specs.append(pl.BlockSpec((TM, TN), lambda i, j: (i, j)))

    out = pl.pallas_call(
        _make_gemm_kernel(relu, res is not None),
        out_shape=jax.ShapeDtypeStruct((Mp, N), out_dtype),
        grid=(n_m, N // TN),
        in_specs=in_specs,
        out_specs=pl.BlockSpec((TM, TN), lambda i, j: (i, j)),
        compiler_params=pltpu.CompilerParams(
            dimension_semantics=("parallel", "parallel"),
            vmem_limit_bytes=_VMEM_LIMIT),
    )(*inputs)
    return out[:M, :]


# ----------------------------- conv / pooling wrappers --------------------------------------

def _window_slices(x, k, stride, pad):
    # x: [B, H, W, C] -> list of k*k shifted views, each [B, Ho, Wo, C] (im2col helper)
    B, H, W, C = x.shape
    if pad:
        x = jnp.pad(x, ((0, 0), (pad, pad), (pad, pad), (0, 0)))
    Hp, Wp = H + 2 * pad, W + 2 * pad
    Ho = (Hp - k) // stride + 1
    Wo = (Wp - k) // stride + 1
    cols = []
    for i in range(k):
        for j in range(k):
            cols.append(x[:, i:i + stride * Ho:stride, j:j + stride * Wo:stride, :])
    return cols, Ho, Wo


@functools.partial(jax.jit, static_argnames=("relu",))
def _conv1x1(x, w, bias, res, *, relu):
    B, H, W, Cin = x.shape
    N = w.shape[-1]
    rm = None if res is None else res.reshape(B * H * W, N)
    out = _gemm(x.reshape(B * H * W, Cin), w.reshape(Cin, N), bias, rm, relu)
    return out.reshape(B, H, W, N)


@functools.partial(jax.jit, static_argnames=("k", "stride", "pad", "relu"))
def _conv_im2col(x, w, bias, *, k, stride, pad, relu):
    # conv1 (7x7, Cin=3) and the 3 stride-2 3x3 convs: outputs are downsampled so the
    # im2col patch matrix is small; one well-filled MXU dot per tile.
    B, H, W, Cin = x.shape
    N = w.shape[-1]
    cols, Ho, Wo = _window_slices(x, k, stride, pad)
    M = B * Ho * Wo
    patches = jnp.stack(cols, axis=3).reshape(M, k * k * Cin)
    wmat = w.reshape(k * k * Cin, N)
    K = k * k * Cin
    Kp = _round_up(K, 128)                           # conv1: 147 -> 256 aligned K
    if Kp != K:
        patches = jnp.pad(patches, ((0, 0), (0, Kp - K)))
        wmat = jnp.pad(wmat, ((0, Kp - K), (0, 0)))
    out = _gemm(patches, wmat, bias, None, relu)
    return out.reshape(B, Ho, Wo, N)


@functools.partial(jax.jit, static_argnames=("relu",))
def _conv3x3_s1(x, w, bias, *, relu):
    # Stride-1 3x3 conv via the flat padded grid + in-kernel halo DMA (no im2col copies).
    B, H, W, Cin = x.shape
    N = w.shape[-1]
    Hp, Wp = H + 2, W + 2
    M_full = B * Hp * Wp
    TM = min(_TM_MAX, _round_up(M_full, 16))
    R = _round_up(M_full, TM)
    halo = 2 * Wp + 2
    buf_rows = TM + halo
    tail = R + halo - M_full
    n_m = R // TM
    TN = _pick_tn(N, n_m)

    flat = jnp.pad(x.astype(jnp.bfloat16),
                   ((0, 0), (1, 1), (1, 1), (0, 0))).reshape(M_full, Cin)
    flat = jnp.pad(flat, ((0, tail), (0, 0)))

    offsets = tuple(di * Wp + dj for di in range(3) for dj in range(3))
    concat_taps = Cin <= 128                         # K = 9*Cin in a single MXU dot
    if concat_taps:
        wmat = w.reshape(9 * Cin, N).astype(jnp.bfloat16)
        w_spec = pl.BlockSpec((9 * Cin, TN), lambda i, j: (0, j))
    else:
        wmat = w.astype(jnp.bfloat16)                # (9, Cin, N)
        w_spec = pl.BlockSpec((9, Cin, TN), lambda i, j: (0, 0, j))

    out = pl.pallas_call(
        _make_conv3x3_kernel(offsets, TM, relu, concat_taps),
        out_shape=jax.ShapeDtypeStruct((R, N), jnp.bfloat16),
        grid=(n_m, N // TN),
        in_specs=[pl.BlockSpec(memory_space=pl.ANY),
                  w_spec,
                  pl.BlockSpec((1, TN), lambda i, j: (0, j))],
        out_specs=pl.BlockSpec((TM, TN), lambda i, j: (i, j)),
        scratch_shapes=[pltpu.VMEM((buf_rows, Cin), jnp.bfloat16),
                        pltpu.SemaphoreType.DMA],
        compiler_params=pltpu.CompilerParams(
            dimension_semantics=("parallel", "parallel"),
            vmem_limit_bytes=_VMEM_LIMIT),
    )(flat, wmat, bias.astype(jnp.float32).reshape(1, N))
    return out[:M_full].reshape(B, Hp, Wp, N)[:, :H, :W, :]


@jax.jit
def maxpool_3x3_s2(x):
    B, H, W, C = x.shape
    Ho = (H - 1) // 2 + 1
    Wo = (W - 1) // 2 + 1
    Hp, Wp = H + 2, W + 2
    M_full = B * Hp * Wp
    TM = min(_TM_MAX, _round_up(M_full, 16))
    R = _round_up(M_full, TM)
    halo = 2 * Wp + 2
    buf_rows = TM + halo
    tail = R + halo - M_full
    pad_val = float(jnp.finfo(jnp.bfloat16).min)     # finite min, not -inf

    flat = jnp.pad(x.astype(jnp.bfloat16), ((0, 0), (1, 1), (1, 1), (0, 0)),
                   constant_values=pad_val).reshape(M_full, C)
    flat = jnp.pad(flat, ((0, tail), (0, 0)), constant_values=pad_val)

    offsets = tuple(di * Wp + dj for di in range(3) for dj in range(3))
    out = pl.pallas_call(
        _make_pool3x3_kernel(offsets, TM),
        out_shape=jax.ShapeDtypeStruct((R, C), jnp.bfloat16),
        grid=(R // TM,),
        in_specs=[pl.BlockSpec(memory_space=pl.ANY)],
        out_specs=pl.BlockSpec((TM, C), lambda i: (i, 0)),
        scratch_shapes=[pltpu.VMEM((buf_rows, C), jnp.bfloat16),
                        pltpu.SemaphoreType.DMA],
        compiler_params=pltpu.CompilerParams(
            dimension_semantics=("parallel",),
            vmem_limit_bytes=_VMEM_LIMIT),
    )(flat)
    full = out[:M_full].reshape(B, Hp, Wp, C)
    return full[:, :2 * Ho:2, :2 * Wo:2, :]          # stride-2 subsample of the max field


@jax.jit
def avgpool_flatten(x):
    # adaptive avg pool to (1,1) + flatten -> [B, C]; keeps (B, HW, C) layout (no transpose)
    B, H, W, C = x.shape
    HW = H * W
    xr = x.reshape(B, HW, C)
    TC = 512 if C % 512 == 0 else C
    return pl.pallas_call(
        _pool_mean_kernel,
        out_shape=jax.ShapeDtypeStruct((B, C), jnp.float32),
        grid=(C // TC,),
        in_specs=[pl.BlockSpec((B, HW, TC), lambda i: (0, 0, i))],
        out_specs=pl.BlockSpec((B, TC), lambda i: (0, i)),
        compiler_params=pltpu.CompilerParams(
            dimension_semantics=("parallel",),
            vmem_limit_bytes=_VMEM_LIMIT),
    )(xr)


def conv_bn_act(x, p, *, stride, pad, relu, res=None):
    k = p["k"]
    if k == 1:
        if stride != 1:
            x = x[:, ::stride, ::stride, :]          # 1x1 stride-2 = subsample + GEMM
        return _conv1x1(x, p["w"], p["bias"], res, relu=relu)
    if k == 3 and stride == 1:
        return _conv3x3_s1(x, p["w"], p["bias"], relu=relu)
    return _conv_im2col(x, p["w"], p["bias"], k=k, stride=stride, pad=pad, relu=relu)


# ----------------------------- ResNet-101 parameters & forward ------------------------------

def init_conv_bn(key, cin, cout, k, gamma=1.0):
    # conv weight in PyTorch layout [Cout, Cin, kh, kw], He-style init (synthetic)
    std = (2.0 / (cin * k * k)) ** 0.5
    w = jax.random.normal(key, (cout, cin, k, k), jnp.float32) * std
    # fold inference-mode BN: gamma, beta=0, running_mean=0, running_var=1, eps=1e-5
    eps = 1e-5
    scale = jnp.full((cout,), gamma / (1.0 + eps) ** 0.5, jnp.float32)
    bias = jnp.zeros((cout,), jnp.float32)
    # per-tap GEMM layout [k*k, Cin, Cout], BN scale folded into the weight, bf16 for MXU
    w_taps = jnp.transpose(w, (2, 3, 1, 0)).reshape(k * k, cin, cout)
    w_taps = (w_taps * scale[None, None, :]).astype(jnp.bfloat16)
    return {"w": w_taps, "bias": bias, "k": k}


def init_params(seed=0):
    base = jax.random.PRNGKey(seed)
    counter = itertools.count()

    def nk():
        return jax.random.fold_in(base, next(counter))

    params = {"conv1": init_conv_bn(nk(), 3, 64, 7)}
    inplanes = 64
    cfg = [("layer1", 64, 3, 1), ("layer2", 128, 4, 2),
           ("layer3", 256, 23, 2), ("layer4", 512, 3, 2)]
    for name, planes, blocks, stride in cfg:
        layer = []
        for b in range(blocks):
            s = stride if b == 0 else 1
            blk = {
                "stride": s,
                "c1": init_conv_bn(nk(), inplanes, planes, 1),
                "c2": init_conv_bn(nk(), planes, planes, 3),
                "c3": init_conv_bn(nk(), planes, planes * 4, 1, gamma=0.5),
            }
            if s != 1 or inplanes != planes * 4:
                blk["ds"] = init_conv_bn(nk(), inplanes, planes * 4, 1)
            layer.append(blk)
            inplanes = planes * 4
        params[name] = layer
    return params


def bottleneck(x, blk):
    s = blk["stride"]
    h = conv_bn_act(x, blk["c1"], stride=1, pad=0, relu=True)
    h = conv_bn_act(h, blk["c2"], stride=s, pad=1, relu=True)
    if "ds" in blk:
        identity = conv_bn_act(x, blk["ds"], stride=s, pad=0, relu=False)
    else:
        identity = x
    return conv_bn_act(h, blk["c3"], stride=1, pad=0, relu=True, res=identity)


def res101_forward(params, x_nchw):
    # input follows PyTorch NCHW convention; kernels run NHWC with bf16 activations
    x = jnp.transpose(x_nchw, (0, 2, 3, 1)).astype(jnp.bfloat16)
    x = conv_bn_act(x, params["conv1"], stride=2, pad=3, relu=True)
    x = maxpool_3x3_s2(x)
    for name in ("layer1", "layer2", "layer3", "layer4"):
        for blk in params[name]:
            x = bottleneck(x, blk)
    return avgpool_flatten(x)               # [B, 2048] f32


# TODO(synk): BatchNorm uses inference-mode (running-stats) semantics folded into the weights
# with synthetic statistics; real pretrained torchvision weights are not reproduced.

if __name__ == "__main__":
    params = init_params(0)
    x = jax.random.normal(jax.random.PRNGKey(0), (2, 3, 32, 32), jnp.float32)
    feat = res101_forward(params, x)
    feat = jax.block_until_ready(feat)
    assert feat.shape == (2, 2048), feat.shape
    assert bool(jnp.all(jnp.isfinite(feat)))
    print("KERNEL_OK")
</pallas_src>

<mosaic_0001>
module attributes {stable_mosaic.version = 11 : i64} {
  func.func @kernel(%arg0: i32, %arg1: i32, %arg2: memref<256x256xbf16, #tpu.memory_space<vmem>>, %arg3: memref<256x64xbf16, #tpu.memory_space<vmem>>, %arg4: memref<1x64xf32, #tpu.memory_space<vmem>>, %arg5: memref<256x64xbf16, #tpu.memory_space<vmem>>) attributes {dimension_semantics = [#tpu.dimension_semantics<parallel>, #tpu.dimension_semantics<parallel>], iteration_bounds = array<i64: 2, 1>, scalar_prefetch = 0 : i64, scratch_operands = 0 : i64, tpu.core_type = #tpu.core_type<tc>, window_params = [{transform_indices = @transform_0, window_bounds = array<i64: 256, 256>}, {transform_indices = @transform_1, window_bounds = array<i64: 256, 64>}, {transform_indices = @transform_2, window_bounds = array<i64: 1, 64>}, {transform_indices = @transform_3, window_bounds = array<i64: 256, 64>}]} {
    %c0 = arith.constant 0 : index
    %c0_0 = arith.constant 0 : index
    %0 = vector.load %arg2[%c0, %c0_0] : memref<256x256xbf16, #tpu.memory_space<vmem>>, vector<256x256xbf16>
    %c0_1 = arith.constant 0 : index
    %c0_2 = arith.constant 0 : index
    %1 = vector.load %arg3[%c0_1, %c0_2] : memref<256x64xbf16, #tpu.memory_space<vmem>>, vector<256x64xbf16>
    %cst = arith.constant dense<0.000000e+00> : vector<256x64xf32>
    %2 = tpu.matmul %0, %1, %cst {dimension_numbers = #tpu.dot_dimension_numbers<[1], [0], [0], [1], [0, 0, 1, 1], [], []>} : vector<256x256xbf16>, vector<256x64xbf16>, vector<256x64xf32> -> vector<256x64xf32>
    %c0_3 = arith.constant 0 : index
    %c0_4 = arith.constant 0 : index
    %3 = vector.load %arg4[%c0_3, %c0_4] : memref<1x64xf32, #tpu.memory_space<vmem>>, vector<1x64xf32>
    %4 = vector.broadcast %3 : vector<1x64xf32> to vector<256x64xf32>
    %5 = arith.addf %2, %4 : vector<256x64xf32>
    %cst_5 = arith.constant 0.000000e+00 : f32
    %6 = vector.broadcast %cst_5 : f32 to vector<256x64xf32>
    %7 = arith.maximumf %5, %6 : vector<256x64xf32>
    %8 = arith.truncf %7 : vector<256x64xf32> to vector<256x64xbf16>
    %c0_6 = arith.constant 0 : index
    %c0_7 = arith.constant 0 : index
    %9 = vector.load %arg5[%c0_6, %c0_7] : memref<256x64xbf16, #tpu.memory_space<vmem>>, vector<256x64xbf16>
    tpu.vector_store %arg5[%c0_6, %c0_7], %8 {strides = array<i32>} : memref<256x64xbf16, #tpu.memory_space<vmem>>, vector<256x64xbf16>,
    return
  }
  func.func @transform_0(%arg0: i32, %arg1: i32) -> (i32, i32) {
    %c0_i32 = arith.constant 0 : i32
    %c0_i32_0 = arith.constant 0 : i32
    return %arg0, %c0_i32 : i32, i32
  }
  func.func @transform_1(%arg0: i32, %arg1: i32) -> (i32, i32) {
    %c0_i32 = arith.constant 0 : i32
    %c0_i32_0 = arith.constant 0 : i32
    return %c0_i32, %arg1 : i32, i32
  }
  func.func @transform_2(%arg0: i32, %arg1: i32) -> (i32, i32) {
    %c0_i32 = arith.constant 0 : i32
    %c0_i32_0 = arith.constant 0 : i32
    return %c0_i32, %arg1 : i32, i32
  }
  func.func @transform_3(%arg0: i32, %arg1: i32) -> (i32, i32) {
    %c0_i32 = arith.constant 0 : i32
    return %arg0, %arg1 : i32, i32
  }
}

</mosaic_0001>

<bundles_post_ra>
// kernel: _conv_im2col.1
= control target key start
LH: loop header
LB: loop body
LE: loop exit
PB: predicated region body
PF: predicated region fallthrough
CT: control target
= control target key end

     0   :  { %8 = vsyncpa [#allocation3], 0  ;;  %s1803_s0 = inlined_call_operand.vmem [shape: bf16[512,256], index: 0, kind: input, shape index: {}]   ;;  %s1804_s1 = inlined_call_operand.vmem [shape: bf16[256,64], index: 1, kind: input, shape index: {}]   ;;  %s1805_s2 = inlined_call_operand.vmem [shape: f32[1,64], index: 2, kind: input, shape index: {}]   ;;  %s1806_s3 = inlined_call_operand.hbm [shape: bf16[512,64], index: 3, kind: output, shape index: {}]  }
   0x1   :  { %10 = vsyncpa [#allocation3 + $0x1], 0  ;;  %s1499_s12 = smov 0   ;;  %s1501_s13 = smov 0  }
   0x2   :  { %s1503_s14 = smov 0   ;;  %s1505_s15 = smov 0  }
   0x3   :  { %s1507_s16 = smov 0   ;;  %s1509_s17 = smov 0  }
   0x4 LB: > { %s1016_s18 = sadd.s32 4294967295, %s1474_s17   ;;  %s1017_s19 = sadd.s32 4294967294, %s1474_s17   ;;  %s1474_s17 = sphi %s1509_s17, %s16_s17   ;;  %s1470_s16 = sphi %s1507_s16, %s1813_s16   ;;  %s1466_s15 = sphi %s1505_s15, %s1812_s15   ;;  %s1462_s14 = sphi %s1503_s14, %s1811_s14   ;;  %s1458_s13 = sphi %s1501_s13, %s1810_s13   ;;  %s1454_s12 = sphi %s1499_s12, %s1809_s12  }
   0x5   : > { %s28_s20 = sadd.s32 1, %s1470_s16  ;;  %s115_s21 = sadd.s32 1, %s1462_s14 }
   0x6   : > { %p30_p0 = scmp.ge.s32.totalorder %s28_s20, 2  ;;  %p125_p1 = scmp.ne.s32.totalorder %s1462_s14, %s1458_s13 }
   0x7   : > { %p126_p2 = scmp.eq.s32.totalorder %s1016_s18, 1  ;;  %p131_p3 = scmp.ne.s32.totalorder %s1458_s13, %s1454_s12 }
   0x8   : > { %s1815_s20 = smov (%p30_p0, %s28_s20), 0  ;;  %p132_p5 = scmp.eq.s32.totalorder %s1017_s19, 1 }
   0x9   : > { %p1539_p4 = por %p126_p2, %p125_p1  ;;  %s110_s23 = ssub.s32 %s1470_s16, %s1815_s20 }
   0xa   : > { %p1022_p6 = scmp.ge.s32.totalorder %s1474_s17, 1  ;;  %p113_p7 = scmp.eq.s32.totalorder %s110_s23, 0 }
   0xb   : > { %p1546_p8 = por %p132_p5, %p131_p3  ;;  %p173_p9 = scmp.lt.s32.totalorder %s1474_s17, 3 }
   0xc   : > { %s1552_s25 = scalar_select %p113_p7, %s1462_s14, %s115_s21  }
   0xd   : > { %p174_p10 = pnand %p1022_p6, %p173_p9 }
   0xe   : > { %v1332_v0 = vld [vmem:[%s1804_s1 + $0x40] sm:$0xff] (!%p174_p10)   ;;  %s1024_s28 = sshll.u32 (!%p174_p10), %s1466_s15, 5  ;;  %v1334_v2 = vld [vmem:[%s1804_s1 + $0x48] sm:$0xff] (!%p174_p10)   ;;  %v1336_v4 = vld [vmem:[%s1804_s1 + $0x50] sm:$0xff] (!%p174_p10)   ;;  %s202_s30 = sand.u32 (!%p174_p10), 1, %s1458_s13   ;;  %vm869_vm0 = vcmask (!%p174_p10), 519168  }
   0xf   : > { %177 = sbr.rel (%p174_p10) target bundleno = 341 (0x155), region = 32  ;;  %v1333_v1 = vld [vmem:[%s1804_s1] sm:$0xff] (!%p174_p10)   ;;  %1147 = vmatprep.subr.bf16.mxu0 (!%p174_p10), %v1332_v0  ;;  %1259 = vmatprep.subr.bf16.mxu1 (!%p174_p10), %v1332_v0  ;;  %v1335_v3 = vld [vmem:[%s1804_s1 + $0x8] sm:$0xff] (!%p174_p10)   ;;  %p206_p11 = scmp.lt.s32.totalorder (!%p174_p10), %s1024_s28, 63  ;;  %v1337_v5 = vld [vmem:[%s1804_s1 + $0x10] sm:$0xff] (!%p174_p10)  }
  0x10   : > { %1148 = vmatpush3.bf16.msra.mxu0 (!%p174_p10), %v1333_v1  ;;  %1267 = vmatpush3.bf16.msra.mxu1 (!%p174_p10), %v1333_v1  ;;  %v1338_v6 = vld [vmem:[%s1804_s1 + $0x58] sm:$0xff] (!%p174_p10)   ;;  %v1340_v8 = vld [vmem:[%s1804_s1 + $0x60] sm:$0xff] (!%p174_p10)   ;;  %v1342_v10 = vld [vmem:[%s1804_s1 + $0x68] sm:$0xff] (!%p174_p10)   ;;  %s1476_s19 = smov (!%p174_p10), [#allocation2]  }
  0x11   : > { %1149 = vmatprep.subr.bf16.mxu0 (!%p174_p10), %v1334_v2  ;;  %1260 = vmatprep.subr.bf16.mxu1 (!%p174_p10), %v1334_v2  ;;  %v1339_v7 = vld [vmem:[%s1804_s1 + $0x18] sm:$0xff] (!%p174_p10)   ;;  %v1341_v9 = vld [vmem:[%s1804_s1 + $0x20] sm:$0xff] (!%p174_p10)   ;;  %v1343_v13 = vld [vmem:[%s1804_s1 + $0x28] sm:$0xff] (!%p174_p10)   ;;  %s1400_s21 = sshll.u32 (!%p174_p10), %s1476_s19, 4  ;;  %s1401_s21 = int_to_ptr.vmem [resolvable:$false] %s1400_s21 }
  0x12   : > { %v1344_v14 = vld [vmem:[%s1804_s1 + $0x70] sm:$0xff] (!%p174_p10)   ;;  %v1346_v16 = vld [vmem:[%s1804_s1 + $0x78] sm:$0xff] (!%p174_p10)   ;;  %v1644_v50 = vld [vmem:[%s1805_s2] ss:$0 sm:$0xff] (!%p174_p10)  ;;  %s1402_s23 = scalar_lea.vmem (!%p174_p10), %s1401_s21, 4096 }
  0x13   : > { %v1345_v15 = vld [vmem:[%s1804_s1 + $0x30] sm:$0xff] (!%p174_p10)   ;;  %v1347_v17 = vld [vmem:[%s1804_s1 + $0x38] sm:$0xff] (!%p174_p10)  }
  0x14   : > { %1150 = vmatpush3.bf16.msra.mxu0 (!%p174_p10), %v1335_v3  ;;  %1268 = vmatpush3.bf16.msra.mxu1 (!%p174_p10), %v1335_v3 }
  0x15   : > { %1151 = vmatprep.subr.bf16.mxu0 (!%p174_p10), %v1336_v4  ;;  %1261 = vmatprep.subr.bf16.mxu1 (!%p174_p10), %v1336_v4 }
  0x16   : > { %s1817_s28 = smov (!%p206_p11, %s1024_s28), 63 }
  0x17   : > { %s1113_s26 = sshll.u32 %s1817_s28, 3  ;;  %s1146_s28 = sshll.u32 %s1466_s15, 11 }
  0x18   : > { %1152 = vmatpush3.bf16.msra.mxu0 %v1337_v5  ;;  %1269 = vmatpush3.bf16.msra.mxu1 %v1337_v5  ;;  %s1585_s5 = scalar_lea.vmem %s1803_s0, %s1113_s26  ;;  %s1743_s11 = scalar_lea.hbm %s1806_s3, %s1146_s28 }
  0x19   : > { %1153 = vmatprep.subr.bf16.mxu0 %v1338_v6  ;;  %1262 = vmatprep.subr.bf16.mxu1 %v1338_v6  ;;  %v1350_v11 = vld [vmem:[%s1585_s5 + $0x4] ss:$8 sps:$4 sm:$0xff]   ;;  %v1348_v18 = vld [vmem:[%s1585_s5] ss:$8 sps:$4 sm:$0xff]   ;;  %v1354_v20 = vld [vmem:[%s1585_s5 + $0x14] ss:$8 sps:$4 sm:$0xff]  }
  0x1a   : > { %v1353_v12 = vld [vmem:[%s1585_s5 + $0x84] ss:$8 sps:$4 sm:$0xff]   ;;  %580 = vmatprep.mubr.bf16.mxu0 %v1350_v11  ;;  %v1351_v19 = vld [vmem:[%s1585_s5 + $0x80] ss:$8 sps:$4 sm:$0xff]   ;;  %v1356_v21 = vld [vmem:[%s1585_s5 + $0x94] ss:$8 sps:$4 sm:$0xff]  }
  0x1b   : > { %644 = vmatprep.mubr.bf16.mxu1 %v1353_v12  ;;  %v1358_v22 = vld [vmem:[%s1585_s5 + $0x10] ss:$8 sps:$4 sm:$0xff]   ;;  %v1360_v24 = vld [vmem:[%s1585_s5 + $0x24] ss:$8 sps:$4 sm:$0xff]   ;;  %v1364_v26 = vld [vmem:[%s1585_s5 + $0x20] ss:$8 sps:$4 sm:$0xff]  }
  0x1c   : > { %1154 = vmatpush3.bf16.msra.mxu0 %v1339_v7  ;;  %1270 = vmatpush3.bf16.msra.mxu1 %v1339_v7  ;;  %v1359_v23 = vld [vmem:[%s1585_s5 + $0x90] ss:$8 sps:$4 sm:$0xff]   ;;  %v1362_v25 = vld [vmem:[%s1585_s5 + $0xa4] ss:$8 sps:$4 sm:$0xff]   ;;  %v1365_v27 = vld [vmem:[%s1585_s5 + $0xa0] ss:$8 sps:$4 sm:$0xff]  }
  0x1d   : > { %1155 = vmatprep.subr.bf16.mxu0 %v1340_v8  ;;  %1263 = vmatprep.subr.bf16.mxu1 %v1340_v8  ;;  %v1366_v28 = vld [vmem:[%s1585_s5 + $0x34] ss:$8 sps:$4 sm:$0xff]   ;;  %v1370_v30 = vld [vmem:[%s1585_s5 + $0x30] ss:$8 sps:$4 sm:$0xff]   ;;  %v1372_v32 = vld [vmem:[%s1585_s5 + $0x44] ss:$8 sps:$4 sm:$0xff]  }
  0x1e   : > { %v1368_v29 = vld [vmem:[%s1585_s5 + $0xb4] ss:$8 sps:$4 sm:$0xff]   ;;  %v1371_v31 = vld [vmem:[%s1585_s5 + $0xb0] ss:$8 sps:$4 sm:$0xff]   ;;  %v1374_v33 = vld [vmem:[%s1585_s5 + $0xc4] ss:$8 sps:$4 sm:$0xff]  }
  0x1f   : > { %v1376_v34 = vld [vmem:[%s1585_s5 + $0x40] ss:$8 sps:$4 sm:$0xff]   ;;  %v1378_v36 = vld [vmem:[%s1585_s5 + $0x54] ss:$8 sps:$4 sm:$0xff]   ;;  %v1382_v38 = vld [vmem:[%s1585_s5 + $0x50] ss:$8 sps:$4 sm:$0xff]  }
  0x20   : > { %1156 = vmatpush3.bf16.msra.mxu0 %v1341_v9  ;;  %1271 = vmatpush3.bf16.msra.mxu1 %v1341_v9  ;;  %v1377_v35 = vld [vmem:[%s1585_s5 + $0xc0] ss:$8 sps:$4 sm:$0xff]   ;;  %v1380_v37 = vld [vmem:[%s1585_s5 + $0xd4] ss:$8 sps:$4 sm:$0xff]   ;;  %v1383_v39 = vld [vmem:[%s1585_s5 + $0xd0] ss:$8 sps:$4 sm:$0xff]  }
  0x21   : > { %1157 = vmatprep.subr.bf16.mxu0 %v1342_v10  ;;  %1264 = vmatprep.subr.bf16.mxu1 %v1342_v10  ;;  %v1384_v40 = vld [vmem:[%s1585_s5 + $0x64] ss:$8 sps:$4 sm:$0xff]   ;;  %v1388_v42 = vld [vmem:[%s1585_s5 + $0x60] ss:$8 sps:$4 sm:$0xff]   ;;  %v1390_v44 = vld [vmem:[%s1585_s5 + $0x74] ss:$8 sps:$4 sm:$0xff]  }
  0x22   : > { %v1386_v41 = vld [vmem:[%s1585_s5 + $0xe4] ss:$8 sps:$4 sm:$0xff]   ;;  %v1389_v43 = vld [vmem:[%s1585_s5 + $0xe0] ss:$8 sps:$4 sm:$0xff]   ;;  %v1392_v45 = vld [vmem:[%s1585_s5 + $0xf4] ss:$8 sps:$4 sm:$0xff]  }
  0x23   : > { %v1394_v46 = vld [vmem:[%s1585_s5 + $0x70] ss:$8 sps:$4 sm:$0xff]   ;;  %s1757_s15 = scalar_lea.sflag [#allocation3], %s202_s30 }
  0x24   : > { %1158 = vmatpush3.bf16.msra.mxu0 %v1343_v13  ;;  %1272 = vmatpush3.bf16.msra.mxu1 %v1343_v13  ;;  %v1395_v47 = vld [vmem:[%s1585_s5 + $0xf0] ss:$8 sps:$4 sm:$0xff]   ;;  %s1023_s5 = sshll.u32 %s202_s30, 7 }
  0x25   : > { %1159 = vmatprep.subr.bf16.mxu0 %v1344_v14  ;;  %1265 = vmatprep.subr.bf16.mxu1 %v1344_v14  ;;  %s1652_s7 = scalar_lea.vmem [#allocation2], %s1023_s5 }
  0x26   : > { %s917_s8 = sshll.u32 %s1652_s7, 4  ;;  %s1745_s8 = int_to_ptr.vmem [resolvable:$true] %s917_s8 }
  0x27   : > { %s1396_s18 = scalar_lea.vmem %s1745_s8, 2048  ;;  %p1403_p1 = scmp.lt.s32.totalorder %s1745_s8, %s1401_s21 }
  0x28   : > { %1160 = vmatpush3.bf16.msra.mxu0 %v1345_v15  ;;  %1273 = vmatpush3.bf16.msra.mxu1 %v1345_v15  ;;  %p1397_p12 = scmp.ne.s32.totalorder %s1745_s8, %s1396_s18  ;;  %p1404_p2 = scmp.lt.s32.totalorder %s1402_s23, %s1396_s18 }
  0x29   : > { %1161 = vmatprep.subr.bf16.mxu0 %v1346_v16  ;;  %1266 = vmatprep.subr.bf16.mxu1 %v1346_v16 }
  0x2a   : > { %p1398_p13 = pnand %p1397_p12, %p1539_p4  ;;  %p1405_p3 = por %p1404_p2, %p1403_p1 }
  0x2c   : > { %1162 = vmatpush3.bf16.msra.mxu0 %v1347_v17  ;;  %1274 = vmatpush3.bf16.msra.mxu1 %v1347_v17  ;;  %p1399_p0 = pneg %p1398_p13 }
  0x2e   : > { %p1406_p5 = pnand %p1405_p3, %p1399_p0 }
  0x2f   : > { %581 = vmatmul.mubr.bf16.vlgmr.msra.gmra.mrb[0].mxu0 %v1348_v18  ;;  %645 = vmatmul.mubr.bf16.vlgmr.msra.gmra.mrb[0].mxu1 %v1351_v19 }
  0x30   : > { %588 = vmatprep.mubr.bf16.mxu0 %v1354_v20  ;;  %652 = vmatprep.mubr.bf16.mxu1 %v1356_v21 }
  0x37   : > { %589 = vmatmul.mubr.bf16.gmra.mrb[4].mxu0 %v1358_v22  ;;  %653 = vmatmul.mubr.bf16.gmra.mrb[4].mxu1 %v1359_v23 }
  0x38   : > { %596 = vmatprep.mubr.bf16.mxu0 %v1360_v24  ;;  %660 = vmatprep.mubr.bf16.mxu1 %v1362_v25 }
  0x3f   : > { %597 = vmatmul.mubr.bf16.gmra.mrb[8].mxu0 %v1364_v26  ;;  %661 = vmatmul.mubr.bf16.gmra.mrb[8].mxu1 %v1365_v27 }
  0x40   : > { %604 = vmatprep.mubr.bf16.mxu0 %v1366_v28  ;;  %668 = vmatprep.mubr.bf16.mxu1 %v1368_v29 }
  0x47   : > { %605 = vmatmul.mubr.bf16.gmra.mrb[12].mxu0 %v1370_v30  ;;  %669 = vmatmul.mubr.bf16.gmra.mrb[12].mxu1 %v1371_v31 }
  0x48   : > { %612 = vmatprep.mubr.bf16.mxu0 %v1372_v32  ;;  %676 = vmatprep.mubr.bf16.mxu1 %v1374_v33 }
  0x4f   : > { %613 = vmatmul.mubr.bf16.gmra.mrb[16].mxu0 %v1376_v34  ;;  %677 = vmatmul.mubr.bf16.gmra.mrb[16].mxu1 %v1377_v35 }
  0x50   : > { %620 = vmatprep.mubr.bf16.mxu0 %v1378_v36  ;;  %684 = vmatprep.mubr.bf16.mxu1 %v1380_v37 }
  0x57   : > { %621 = vmatmul.mubr.bf16.gmra.mrb[20].mxu0 %v1382_v38  ;;  %685 = vmatmul.mubr.bf16.gmra.mrb[20].mxu1 %v1383_v39 }
  0x58   : > { %628 = vmatprep.mubr.bf16.mxu0 %v1384_v40  ;;  %692 = vmatprep.mubr.bf16.mxu1 %v1386_v41 }
  0x5f   : > { %629 = vmatmul.mubr.bf16.gmra.mrb[24].mxu0 %v1388_v42  ;;  %693 = vmatmul.mubr.bf16.gmra.mrb[24].mxu1 %v1389_v43 }
  0x60   : > { %636 = vmatprep.mubr.bf16.mxu0 %v1390_v44  ;;  %700 = vmatprep.mubr.bf16.mxu1 %v1392_v45 }
  0x67   : > { %637 = vmatmul.mubr.bf16.gmra.mrb[28].mxu0 %v1394_v46  ;;  %701 = vmatmul.mubr.bf16.gmra.mrb[28].mxu1 %v1395_v47 }
 0x102   : > { %v1163_v48 = vpop.f32.mrb[0].mxu0  ;;  %v1211_v49 = vpop.f32.mrb[0].mxu1 }
 0x103   : > { %v1164_v51 = vpop.f32.mrb[1].mxu0  ;;  %v1212_v52 = vpop.f32.mrb[1].mxu1 }
 0x104   : > { %v1165_v53 = vadd.f32 %v1164_v51, %v1163_v48  ;;  %v1213_v54 = vadd.f32 %v1212_v52, %v1211_v49  ;;  %v1166_v55 = vpop.f32.mrb[2].mxu0  ;;  %v1214_v56 = vpop.f32.mrb[2].mxu1 }
 0x105   : > { %v1167_v57 = vpop.f32.mrb[3].mxu0  ;;  %v1215_v58 = vpop.f32.mrb[3].mxu1 }
 0x106   : > { %v583_v59 = vadd.f32 %v1165_v53, %v1644_v50  ;;  %v647_v60 = vadd.f32 %v1213_v54, %v1644_v50  ;;  %v1168_v61 = vadd.f32 %v1167_v57, %v1166_v55  ;;  %v1216_v62 = vadd.f32 %v1215_v58, %v1214_v56 }
 0x108   : > { %v709_v63 = vmax.f32 %v583_v59, 0.0  ;;  %v725_v0 = vmax.f32 %v647_v60, 0.0  ;;  %v586_v1 = vadd.f32 %v1168_v61, %v1644_v50  ;;  %v650_v2 = vadd.f32 %v1216_v62, %v1644_v50 }
 0x10a   : > { %v1114_v3 = vpack.c.bf16 %v709_v63, %v709_v63  ;;  %v1130_v4 = vpack.c.bf16 %v725_v0, %v725_v0  ;;  %v710_v5 = vmax.f32 %v586_v1, 0.0  ;;  %v726_v6 = vmax.f32 %v650_v2, 0.0  ;;  %v1169_v7 = vpop.f32.mrb[4].mxu0  ;;  %v1217_v8 = vpop.f32.mrb[4].mxu1 }
 0x10b   : > { %v1170_v9 = vpop.f32.mrb[5].mxu0  ;;  %v1218_v10 = vpop.f32.mrb[5].mxu1 }
 0x10c   : > { %870 = vst.msk [vmem:[%s1652_s7] sm:$0xf] %vm869_vm0, %v1114_v3  ;;  %886 = vst.msk [vmem:[%s1652_s7 + $0x40] sm:$0xf] %vm869_vm0, %v1130_v4  ;;  %v1115_v11 = vpack.c.bf16 %v710_v5, %v710_v5  ;;  %v1131_v12 = vpack.c.bf16 %v726_v6, %v726_v6  ;;  %v1171_v13 = vadd.f32 %v1170_v9, %v1169_v7  ;;  %v1172_v15 = vpop.f32.mrb[6].mxu0  ;;  %v1220_v16 = vpop.f32.mrb[6].mxu1 }
 0x10d   : > { %v1219_v14 = vadd.f32 %v1218_v10, %v1217_v8  ;;  %v1173_v17 = vpop.f32.mrb[7].mxu0  ;;  %v1221_v18 = vpop.f32.mrb[7].mxu1 }
 0x10e   : > { %871 = vst.msk [vmem:[%s1652_s7 + $0x4] sm:$0xf] %vm869_vm0, %v1115_v11  ;;  %887 = vst.msk [vmem:[%s1652_s7 + $0x44] sm:$0xf] %vm869_vm0, %v1131_v12  ;;  %v591_v19 = vadd.f32 %v1171_v13, %v1644_v50  ;;  %v1174_v21 = vadd.f32 %v1173_v17, %v1172_v15  ;;  %v1222_v22 = vadd.f32 %v1221_v18, %v1220_v16 }
 0x10f   : > { %v655_v20 = vadd.f32 %v1219_v14, %v1644_v50 }
 0x110   : > { %v711_v23 = vmax.f32 %v591_v19, 0.0  ;;  %v594_v25 = vadd.f32 %v1174_v21, %v1644_v50  ;;  %v658_v26 = vadd.f32 %v1222_v22, %v1644_v50 }
 0x111   : > { %v727_v24 = vmax.f32 %v655_v20, 0.0 }
 0x112   : > { %v1116_v27 = vpack.c.bf16 %v711_v23, %v711_v23  ;;  %v712_v29 = vmax.f32 %v594_v25, 0.0  ;;  %v728_v30 = vmax.f32 %v658_v26, 0.0  ;;  %v1175_v31 = vpop.f32.mrb[8].mxu0  ;;  %v1223_v32 = vpop.f32.mrb[8].mxu1 }
 0x113   : > { %v1132_v28 = vpack.c.bf16 %v727_v24, %v727_v24  ;;  %v1176_v33 = vpop.f32.mrb[9].mxu0  ;;  %v1224_v34 = vpop.f32.mrb[9].mxu1 }
 0x114   : > { %872 = vst.msk [vmem:[%s1652_s7 + $0x8] sm:$0xf] %vm869_vm0, %v1116_v27  ;;  %v1117_v35 = vpack.c.bf16 %v712_v29, %v712_v29  ;;  %v1133_v36 = vpack.c.bf16 %v728_v30, %v728_v30  ;;  %v1177_v37 = vadd.f32 %v1176_v33, %v1175_v31  ;;  %v1225_v38 = vadd.f32 %v1224_v34, %v1223_v32  ;;  %v1178_v39 = vpop.f32.mrb[10].mxu0  ;;  %v1226_v40 = vpop.f32.mrb[10].mxu1 }
 0x115   : > { %888 = vst.msk [vmem:[%s1652_s7 + $0x48] sm:$0xf] %vm869_vm0, %v1132_v28  ;;  %v1179_v41 = vpop.f32.mrb[11].mxu0  ;;  %v1227_v42 = vpop.f32.mrb[11].mxu1 }
 0x116   : > { %873 = vst.msk [vmem:[%s1652_s7 + $0xc] sm:$0xf] %vm869_vm0, %v1117_v35  ;;  %889 = vst.msk [vmem:[%s1652_s7 + $0x4c] sm:$0xf] %vm869_vm0, %v1133_v36  ;;  %v599_v43 = vadd.f32 %v1177_v37, %v1644_v50  ;;  %v663_v44 = vadd.f32 %v1225_v38, %v1644_v50  ;;  %v1180_v45 = vadd.f32 %v1179_v41, %v1178_v39 }
 0x117   : > { %v1228_v46 = vadd.f32 %v1227_v42, %v1226_v40 }
 0x118   : > { %v713_v47 = vmax.f32 %v599_v43, 0.0  ;;  %v729_v48 = vmax.f32 %v663_v44, 0.0  ;;  %v602_v49 = vadd.f32 %v1180_v45, %v1644_v50 }
 0x119   : > { %v666_v51 = vadd.f32 %v1228_v46, %v1644_v50 }
 0x11a   : > { %v1118_v52 = vpack.c.bf16 %v713_v47, %v713_v47  ;;  %v1134_v53 = vpack.c.bf16 %v729_v48, %v729_v48  ;;  %v714_v54 = vmax.f32 %v602_v49, 0.0  ;;  %v1181_v56 = vpop.f32.mrb[12].mxu0  ;;  %v1229_v57 = vpop.f32.mrb[12].mxu1 }
 0x11b   : > { %v730_v55 = vmax.f32 %v666_v51, 0.0  ;;  %v1182_v58 = vpop.f32.mrb[13].mxu0  ;;  %v1230_v59 = vpop.f32.mrb[13].mxu1 }
 0x11c   : > { %874 = vst.msk [vmem:[%s1652_s7 + $0x10] sm:$0xf] %vm869_vm0, %v1118_v52  ;;  %890 = vst.msk [vmem:[%s1652_s7 + $0x50] sm:$0xf] %vm869_vm0, %v1134_v53  ;;  %v1119_v60 = vpack.c.bf16 %v714_v54, %v714_v54  ;;  %v1183_v62 = vadd.f32 %v1182_v58, %v1181_v56  ;;  %v1231_v63 = vadd.f32 %v1230_v59, %v1229_v57  ;;  %v1184_v0 = vpop.f32.mrb[14].mxu0  ;;  %v1232_v1 = vpop.f32.mrb[14].mxu1 }
 0x11d   : > { %v1135_v61 = vpack.c.bf16 %v730_v55, %v730_v55  ;;  %v1185_v2 = vpop.f32.mrb[15].mxu0  ;;  %v1233_v3 = vpop.f32.mrb[15].mxu1 }
 0x11e   : > { %875 = vst.msk [vmem:[%s1652_s7 + $0x14] sm:$0xf] %vm869_vm0, %v1119_v60  ;;  %v607_v4 = vadd.f32 %v1183_v62, %v1644_v50  ;;  %v671_v5 = vadd.f32 %v1231_v63, %v1644_v50  ;;  %v1186_v6 = vadd.f32 %v1185_v2, %v1184_v0  ;;  %v1234_v7 = vadd.f32 %v1233_v3, %v1232_v1 }
 0x11f   : > { %891 = vst.msk [vmem:[%s1652_s7 + $0x54] sm:$0xf] %vm869_vm0, %v1135_v61 }
 0x120   : > { %v715_v8 = vmax.f32 %v607_v4, 0.0  ;;  %v731_v9 = vmax.f32 %v671_v5, 0.0  ;;  %v610_v10 = vadd.f32 %v1186_v6, %v1644_v50  ;;  %v674_v11 = vadd.f32 %v1234_v7, %v1644_v50 }
 0x122   : > { %v1120_v12 = vpack.c.bf16 %v715_v8, %v715_v8  ;;  %v1136_v13 = vpack.c.bf16 %v731_v9, %v731_v9  ;;  %v716_v14 = vmax.f32 %v610_v10, 0.0  ;;  %v732_v15 = vmax.f32 %v674_v11, 0.0  ;;  %v1187_v16 = vpop.f32.mrb[16].mxu0  ;;  %v1235_v17 = vpop.f32.mrb[16].mxu1 }
 0x123   : > { %v1188_v18 = vpop.f32.mrb[17].mxu0  ;;  %v1236_v19 = vpop.f32.mrb[17].mxu1 }
 0x124   : > { %876 = vst.msk [vmem:[%s1652_s7 + $0x18] sm:$0xf] %vm869_vm0, %v1120_v12  ;;  %892 = vst.msk [vmem:[%s1652_s7 + $0x58] sm:$0xf] %vm869_vm0, %v1136_v13  ;;  %v1121_v20 = vpack.c.bf16 %v716_v14, %v716_v14  ;;  %v1137_v21 = vpack.c.bf16 %v732_v15, %v732_v15  ;;  %v1189_v22 = vadd.f32 %v1188_v18, %v1187_v16  ;;  %v1190_v24 = vpop.f32.mrb[18].mxu0  ;;  %v1238_v25 = vpop.f32.mrb[18].mxu1 }
 0x125   : > { %v1237_v23 = vadd.f32 %v1236_v19, %v1235_v17  ;;  %v1191_v26 = vpop.f32.mrb[19].mxu0  ;;  %v1239_v27 = vpop.f32.mrb[19].mxu1 }
 0x126   : > { %877 = vst.msk [vmem:[%s1652_s7 + $0x1c] sm:$0xf] %vm869_vm0, %v1121_v20  ;;  %893 = vst.msk [vmem:[%s1652_s7 + $0x5c] sm:$0xf] %vm869_vm0, %v1137_v21  ;;  %v615_v28 = vadd.f32 %v1189_v22, %v1644_v50  ;;  %v1192_v30 = vadd.f32 %v1191_v26, %v1190_v24  ;;  %v1240_v31 = vadd.f32 %v1239_v27, %v1238_v25 }
 0x127   : > { %v679_v29 = vadd.f32 %v1237_v23, %v1644_v50 }
 0x128   : > { %v717_v32 = vmax.f32 %v615_v28, 0.0  ;;  %v618_v34 = vadd.f32 %v1192_v30, %v1644_v50  ;;  %v682_v35 = vadd.f32 %v1240_v31, %v1644_v50 }
 0x129   : > { %v733_v33 = vmax.f32 %v679_v29, 0.0 }
 0x12a   : > { %v1122_v36 = vpack.c.bf16 %v717_v32, %v717_v32  ;;  %v718_v38 = vmax.f32 %v618_v34, 0.0  ;;  %v734_v39 = vmax.f32 %v682_v35, 0.0  ;;  %v1193_v40 = vpop.f32.mrb[20].mxu0  ;;  %v1241_v41 = vpop.f32.mrb[20].mxu1 }
 0x12b   : > { %v1138_v37 = vpack.c.bf16 %v733_v33, %v733_v33  ;;  %v1194_v42 = vpop.f32.mrb[21].mxu0  ;;  %v1242_v43 = vpop.f32.mrb[21].mxu1 }
 0x12c   : > { %878 = vst.msk [vmem:[%s1652_s7 + $0x20] sm:$0xf] %vm869_vm0, %v1122_v36  ;;  %v1123_v44 = vpack.c.bf16 %v718_v38, %v718_v38  ;;  %v1139_v45 = vpack.c.bf16 %v734_v39, %v734_v39  ;;  %v1195_v46 = vadd.f32 %v1194_v42, %v1193_v40  ;;  %v1243_v47 = vadd.f32 %v1242_v43, %v1241_v41  ;;  %v1196_v48 = vpop.f32.mrb[22].mxu0  ;;  %v1244_v49 = vpop.f32.mrb[22].mxu1 }
 0x12d   : > { %894 = vst.msk [vmem:[%s1652_s7 + $0x60] sm:$0xf] %vm869_vm0, %v1138_v37  ;;  %v1197_v51 = vpop.f32.mrb[23].mxu0  ;;  %v1245_v52 = vpop.f32.mrb[23].mxu1 }
 0x12e   : > { %879 = vst.msk [vmem:[%s1652_s7 + $0x24] sm:$0xf] %vm869_vm0, %v1123_v44  ;;  %895 = vst.msk [vmem:[%s1652_s7 + $0x64] sm:$0xf] %vm869_vm0, %v1139_v45  ;;  %v623_v53 = vadd.f32 %v1195_v46, %v1644_v50  ;;  %v687_v54 = vadd.f32 %v1243_v47, %v1644_v50  ;;  %v1198_v55 = vadd.f32 %v1197_v51, %v1196_v48 }
 0x12f   : > { %v1246_v56 = vadd.f32 %v1245_v52, %v1244_v49 }
 0x130   : > { %v719_v57 = vmax.f32 %v623_v53, 0.0  ;;  %v735_v58 = vmax.f32 %v687_v54, 0.0  ;;  %v626_v59 = vadd.f32 %v1198_v55, %v1644_v50 }
 0x131   : > { %v690_v60 = vadd.f32 %v1246_v56, %v1644_v50 }
 0x132   : > { %v1124_v61 = vpack.c.bf16 %v719_v57, %v719_v57  ;;  %v1140_v62 = vpack.c.bf16 %v735_v58, %v735_v58  ;;  %v720_v63 = vmax.f32 %v626_v59, 0.0  ;;  %v1199_v1 = vpop.f32.mrb[24].mxu0  ;;  %v1247_v2 = vpop.f32.mrb[24].mxu1 }
 0x133   : > { %v736_v0 = vmax.f32 %v690_v60, 0.0  ;;  %v1200_v3 = vpop.f32.mrb[25].mxu0  ;;  %v1248_v4 = vpop.f32.mrb[25].mxu1 }
 0x134   : > { %880 = vst.msk [vmem:[%s1652_s7 + $0x28] sm:$0xf] %vm869_vm0, %v1124_v61  ;;  %896 = vst.msk [vmem:[%s1652_s7 + $0x68] sm:$0xf] %vm869_vm0, %v1140_v62  ;;  %v1125_v5 = vpack.c.bf16 %v720_v63, %v720_v63  ;;  %v1201_v7 = vadd.f32 %v1200_v3, %v1199_v1  ;;  %v1249_v8 = vadd.f32 %v1248_v4, %v1247_v2  ;;  %v1202_v9 = vpop.f32.mrb[26].mxu0  ;;  %v1250_v10 = vpop.f32.mrb[26].mxu1 }
 0x135   : > { %v1141_v6 = vpack.c.bf16 %v736_v0, %v736_v0  ;;  %v1203_v11 = vpop.f32.mrb[27].mxu0  ;;  %v1251_v12 = vpop.f32.mrb[27].mxu1 }
 0x136   : > { %881 = vst.msk [vmem:[%s1652_s7 + $0x2c] sm:$0xf] %vm869_vm0, %v1125_v5  ;;  %v631_v13 = vadd.f32 %v1201_v7, %v1644_v50  ;;  %v695_v14 = vadd.f32 %v1249_v8, %v1644_v50  ;;  %v1204_v15 = vadd.f32 %v1203_v11, %v1202_v9  ;;  %v1252_v16 = vadd.f32 %v1251_v12, %v1250_v10 }
 0x137   : > { %897 = vst.msk [vmem:[%s1652_s7 + $0x6c] sm:$0xf] %vm869_vm0, %v1141_v6 }
 0x138   : > { %v721_v17 = vmax.f32 %v631_v13, 0.0  ;;  %v737_v18 = vmax.f32 %v695_v14, 0.0  ;;  %v634_v19 = vadd.f32 %v1204_v15, %v1644_v50  ;;  %v698_v20 = vadd.f32 %v1252_v16, %v1644_v50 }
 0x13a   : > { %v1126_v21 = vpack.c.bf16 %v721_v17, %v721_v17  ;;  %v1142_v22 = vpack.c.bf16 %v737_v18, %v737_v18  ;;  %v722_v23 = vmax.f32 %v634_v19, 0.0  ;;  %v738_v24 = vmax.f32 %v698_v20, 0.0  ;;  %v1205_v25 = vpop.f32.mrb[28].mxu0  ;;  %v1253_v26 = vpop.f32.mrb[28].mxu1 }
 0x13b   : > { %v1206_v27 = vpop.f32.mrb[29].mxu0  ;;  %v1254_v28 = vpop.f32.mrb[29].mxu1 }
 0x13c   : > { %882 = vst.msk [vmem:[%s1652_s7 + $0x30] sm:$0xf] %vm869_vm0, %v1126_v21  ;;  %898 = vst.msk [vmem:[%s1652_s7 + $0x70] sm:$0xf] %vm869_vm0, %v1142_v22  ;;  %v1127_v29 = vpack.c.bf16 %v722_v23, %v722_v23  ;;  %v1143_v30 = vpack.c.bf16 %v738_v24, %v738_v24  ;;  %v1207_v31 = vadd.f32 %v1206_v27, %v1205_v25  ;;  %v1208_v33 = vpop.f32.mrb[30].mxu0  ;;  %v1256_v34 = vpop.f32.mrb[30].mxu1 }
 0x13d   : > { %v1255_v32 = vadd.f32 %v1254_v28, %v1253_v26  ;;  %v1209_v35 = vpop.f32.mrb[31].mxu0  ;;  %v1257_v36 = vpop.f32.mrb[31].mxu1 }
 0x13e   : > { %883 = vst.msk [vmem:[%s1652_s7 + $0x34] sm:$0xf] %vm869_vm0, %v1127_v29  ;;  %899 = vst.msk [vmem:[%s1652_s7 + $0x74] sm:$0xf] %vm869_vm0, %v1143_v30  ;;  %v639_v37 = vadd.f32 %v1207_v31, %v1644_v50  ;;  %v1210_v39 = vadd.f32 %v1209_v35, %v1208_v33  ;;  %v1258_v40 = vadd.f32 %v1257_v36, %v1256_v34 }
 0x13f   : > { %v703_v38 = vadd.f32 %v1255_v32, %v1644_v50 }
 0x140   : > { %v723_v41 = vmax.f32 %v639_v37, 0.0  ;;  %v642_v43 = vadd.f32 %v1210_v39, %v1644_v50  ;;  %v706_v44 = vadd.f32 %v1258_v40, %v1644_v50 }
 0x141   : > { %v739_v42 = vmax.f32 %v703_v38, 0.0 }
 0x142   : > { %v1128_v45 = vpack.c.bf16 %v723_v41, %v723_v41  ;;  %v724_v47 = vmax.f32 %v642_v43, 0.0  ;;  %v740_v48 = vmax.f32 %v706_v44, 0.0 }
 0x143   : > { %v1144_v46 = vpack.c.bf16 %v739_v42, %v739_v42 }
 0x144   : > { %884 = vst.msk [vmem:[%s1652_s7 + $0x38] sm:$0xf] %vm869_vm0, %v1128_v45  ;;  %v1129_v50 = vpack.c.bf16 %v724_v47, %v724_v47  ;;  %v1145_v49 = vpack.c.bf16 %v740_v48, %v740_v48 }
 0x145   : > { %900 = vst.msk [vmem:[%s1652_s7 + $0x78] sm:$0xf] %vm869_vm0, %v1144_v46 }
 0x146   : > { %885 = vst.msk [vmem:[%s1652_s7 + $0x3c] sm:$0xf] %vm869_vm0, %v1129_v50  ;;  %901 = vst.msk [vmem:[%s1652_s7 + $0x7c] sm:$0xf] %vm869_vm0, %v1145_v49 }
 0x147   : > { %1409 = shalt.err (!%p1406_p5)
}
 0x148   : > { %s1410_s26 = scalar_lea.hbm %s1743_s11, 2048  ;;  %s1414_s30 = scalar_lea.hbm %s1806_s3, 4096 }
 0x149   : > { %p1411_p6 = scmp.ne.s32.totalorder %s1743_s11, %s1410_s26  ;;  %p1415_p10 = scmp.lt.u32.totalorder %s1743_s11, %s1806_s3 }
 0x14a   : > { %p1416_p11 = scmp.lt.u32.totalorder %s1414_s30, %s1410_s26  ;;  %p1418_p13 = scmp.lt.u32.totalorder %s1410_s26, %s1743_s11 }
 0x14b   : > { %p1412_p7 = pnand %p1411_p6, %p1539_p4 }
 0x14c   : > { %p1417_p12 = por %p1416_p11, %p1415_p10 }
 0x14d   : > { %p1413_p9 = pneg %p1412_p7 }
 0x14e   : > { %p1419_p0 = por %p1418_p13, %p1417_p12 }
 0x150   : > { %p1420_p1 = pnand %p1419_p0, %p1413_p9 }
 0x152   : > { %1423 = shalt.err (!%p1420_p1)
}
 0x153   : > { %s1477_s5 = smov 64   ;;  %s1478_s7 = smov 4  }
 0x154   : > { %1275 = dma.vmem_to_hbm [thread:$0]  (%p1539_p4), %s1745_s8, 2048, %s1743_s11, %s1757_s15, %s1477_s5, %s1477_s5, %s1478_s7  }
 0x155 PF: > { %p1281_p2 = scmp.ge.s32.totalorder %s1474_s17, 2  ;;  %s932_s28 = sand.u32 1, %s1454_s12  }
 0x156   : > { %s933_s9 = scalar_lea.sflag [#allocation3], %s932_s28 }
 0x157   : > { %p1278_p3 = pnand %p1281_p2, %p1546_p8 }
 0x159   : > { %1449 = dma.done.wait (!%p1278_p3), %s933_s9, 2048  }
 0x15a   : > { %1451 = vsyncadd (!%p1278_p3), %s933_s9, 4294965248  ;;  %s16_s17 = sadd.s32 1, %s1474_s17   ;;  %s1809_s12 = smov %s1458_s13 }
 0x15b   : > { %p13_p5 = scmp.ge.s32.totalorder %s16_s17, 4   ;;  %s1810_s13 = smov %s1462_s14 }
 0x15c   : > { %s1811_s14 = smov %s1552_s25  ;;  %s1812_s15 = smov %s1470_s16 }
 0x15d   : > { %s1813_s16 = smov %s1815_s20  ;;  %15 = sbr.rel (!%p13_p5) target bundleno = 4 (0x4), region = 73 }
 0x164   :  { %938 = vsyncpa [#allocation3], 1 }
 0x165   :  { %940 = vsyncpa [#allocation3 + $0x1], 1 }

</bundles_post_ra>
